<compile_context>
chip_gen: v5e
topology: v5e:2x2
jax: 0.10.0
libtpu: 0.0.40
codegen_flags: <defaults>
</compile_context>

<pallas_src>
import functools
from collections import Counter

import numpy as np
import jax
import jax.numpy as jnp
from jax.experimental import pallas as pl
from jax.experimental.pallas import tpu as pltpu


def resolve_prediction(decisions):
    predict = []
    for d in decisions:
        counts = Counter(d)
        predict.append(counts.most_common(1)[0][0])
    predict = np.array(predict)
    return predict


def _pick_f_tile(F):
    """Largest lane-aligned tile of the feature axis F; keeps per-step VMEM small so
    the same blocks work on v5e (16 MiB scoped), v6e and v7x (64 MiB physical)."""
    for t in (512, 256, 128):
        if F % t == 0:
            return t
    return F  # F not a multiple of 128: single full-width block (block == full dim)


# --------- Kernel 1 (fused): eval_input built in VMEM + padded-class matmul ----------
def _fused_scores_kernel(x_ref, half_ref, w_ref, b_ref, sp_ref, sm_ref,
                         acc_p, acc_m, *, sigma):
    f = pl.program_id(1)

    @pl.when(f == 0)
    def _():
        acc_p[...] = jnp.zeros_like(acc_p)
        acc_m[...] = jnp.zeros_like(acc_m)

    xt = x_ref[0]                        # (1, TF)   clean audio tile
    nt = half_ref[0]                     # (Sh, TF)  +half of the antithetic noise
    wt = w_ref[...]                      # (TF, Kp)
    ns = nt * sigma
    eval_plus = ns + xt                  # eval_input built in VMEM (never hits HBM)
    eval_minus = xt - ns
    acc_p[...] += jnp.dot(eval_plus, wt, preferred_element_type=jnp.float32)
    acc_m[...] += jnp.dot(eval_minus, wt, preferred_element_type=jnp.float32)

    @pl.when(f == pl.num_programs(1) - 1)
    def _():
        bias = b_ref[...]                # (1, Kp)
        sp_ref[...] = (acc_p[...] + bias)[None]
        sm_ref[...] = (acc_m[...] + bias)[None]


def fused_scores_pallas(x2d, half, w_pad, b_pad, sigma, *, f_tile=None):
    """scores(x + sigma*n) and scores(x - sigma*n) for every half-noise sample.
    x2d: (A, F), half: (A, Sh, F), w_pad: (F, Kp), b_pad: (1, Kp) -> two (A, Sh, Kp)."""
    A, F = x2d.shape
    Sh = half.shape[1]
    Kp = w_pad.shape[1]
    tf = _pick_f_tile(F) if f_tile is None else f_tile
    x3d = x2d.reshape(A, 1, F)
    return pl.pallas_call(
        functools.partial(_fused_scores_kernel, sigma=sigma),
        out_shape=(jax.ShapeDtypeStruct((A, Sh, Kp), jnp.float32),
                   jax.ShapeDtypeStruct((A, Sh, Kp), jnp.float32)),
        grid=(A, F // tf),
        in_specs=[
            pl.BlockSpec((1, 1, tf), lambda a, f: (a, 0, f)),
            pl.BlockSpec((1, Sh, tf), lambda a, f: (a, 0, f)),
            pl.BlockSpec((tf, Kp), lambda a, f: (f, 0)),
            pl.BlockSpec((1, Kp), lambda a, f: (0, 0)),
        ],
        out_specs=(pl.BlockSpec((1, Sh, Kp), lambda a, f: (a, 0, 0)),
                   pl.BlockSpec((1, Sh, Kp), lambda a, f: (a, 0, 0))),
        scratch_shapes=[pltpu.VMEM((Sh, Kp), jnp.float32),
                        pltpu.VMEM((Sh, Kp), jnp.float32)],
        compiler_params=pltpu.CompilerParams(
            dimension_semantics=("parallel", "arbitrary")),
    )(x3d, half, w_pad, b_pad)


# --------- Kernel 2: zero-noise (adversarial) scores, tiled over F --------------------
def _base_scores_kernel(x_ref, w_ref, b_ref, out_ref, acc):
    f = pl.program_id(0)

    @pl.when(f == 0)
    def _():
        acc[...] = jnp.zeros_like(acc)

    acc[...] += jnp.dot(x_ref[...], w_ref[...], preferred_element_type=jnp.float32)

    @pl.when(f == pl.num_programs(0) - 1)
    def _():
        out_ref[...] = acc[...] + b_ref[...]


def base_scores_pallas(x2d, w_pad, b_pad, *, f_tile=None):
    A, F = x2d.shape
    Kp = w_pad.shape[1]
    tf = _pick_f_tile(F) if f_tile is None else f_tile
    return pl.pallas_call(
        _base_scores_kernel,
        out_shape=jax.ShapeDtypeStruct((A, Kp), jnp.float32),
        grid=(F // tf,),
        in_specs=[pl.BlockSpec((A, tf), lambda f: (0, f)),
                  pl.BlockSpec((tf, Kp), lambda f: (f, 0)),
                  pl.BlockSpec((1, Kp), lambda f: (0, 0))],
        out_specs=pl.BlockSpec((A, Kp), lambda f: (0, 0)),
        scratch_shapes=[pltpu.VMEM((A, Kp), jnp.float32)],
        compiler_params=pltpu.CompilerParams(dimension_semantics=("arbitrary",)),
    )(x2d, w_pad, b_pad)


# --------- Kernel 3: NES gradient sum  sum_j (loss+_j - loss-_j) * noise_j ------------
def _grad_sum_kernel(dl_ref, half_ref, out_ref):
    dl = dl_ref[0]                       # (1, Sh)
    nt = half_ref[0]                     # (Sh, TF)
    # (1, Sh) @ (Sh, TF): multiply-accumulate on the MXU, lane-dense TF output.
    out_ref[...] = jnp.dot(dl, nt, preferred_element_type=jnp.float32)[None]


def grad_sum_pallas(dloss, half, *, f_tile=None):
    """dloss: (A, Sh), half: (A, Sh, F) -> (A, F). /S /sigma scales deferred to caller."""
    A, Sh = dloss.shape
    F = half.shape[2]
    tf = _pick_f_tile(F) if f_tile is None else f_tile
    dl3 = dloss.reshape(A, 1, Sh)
    out = pl.pallas_call(
        _grad_sum_kernel,
        out_shape=jax.ShapeDtypeStruct((A, 1, F), jnp.float32),
        grid=(A, F // tf),
        in_specs=[pl.BlockSpec((1, 1, Sh), lambda a, f: (a, 0, 0)),
                  pl.BlockSpec((1, Sh, tf), lambda a, f: (a, 0, f))],
        out_specs=pl.BlockSpec((1, 1, tf), lambda a, f: (a, 0, f)),
        compiler_params=pltpu.CompilerParams(
            dimension_semantics=("parallel", "parallel")),
    )(dl3, half)
    return out.reshape(A, F)


# --------- Small host-side/JAX helpers -------------------------------------------------
def _margin_loss(scores, onehot):
    # Synthetic CW-style margin (the real fakebob loss lives inside the black-box EOT
    # wrapper; the sign convention here is a property of the synthetic stand-in).
    true_score = jnp.sum(scores * onehot, axis=-1)
    other_max = jnp.max(jnp.where(onehot > 0.0, -jnp.inf, scores), axis=-1)
    return true_score - other_max


class SyntheticEOTWrapper:
    """Deterministic linear classifier standing in for the black-box speaker model."""

    def __init__(self, n_channels, N, n_classes, key):
        self.EOT_size = 1
        self.EOT_batch_size = 1
        self.n_classes = n_classes
        F = n_channels * N
        kw, kb = jax.random.split(key)
        self.W = jax.random.normal(kw, (F, n_classes), jnp.float32) * 0.05
        self.b = jax.random.normal(kb, (1, n_classes), jnp.float32) * 0.05
        # Lane-padded parameters (classes -> multiple of 128): padded columns get a
        # large-negative bias so they never win the margin max / argmax.
        Kp = max(128, ((n_classes + 127) // 128) * 128)
        self.n_classes_padded = Kp
        self.W_padded = jnp.zeros((F, Kp), jnp.float32).at[:, :n_classes].set(self.W)
        self.b_padded = jnp.full((1, Kp), -1e9, jnp.float32).at[:, :n_classes].set(self.b)


def _nes_core(x, y, w_pad, b_pad, key, *, sigma, samples_per_draw, batch_size,
              eot_num_batches, n_classes):
    A, C, N = x.shape
    F = C * N
    Kp = w_pad.shape[1]
    num_batches = samples_per_draw // batch_size
    half_size = batch_size // 2
    inv_eot = 1.0 / eot_num_batches

    x2d = x.reshape(A, F)

    # Zero-noise (adversarial) sample — the first column of draw batch 0 in the ref.
    base_scores = base_scores_pallas(x2d, w_pad, b_pad) * inv_eot       # (A, Kp)
    onehot = jax.nn.one_hot(y, Kp, dtype=jnp.float32)                   # (A, Kp)
    adver_loss = _margin_loss(base_scores, onehot)                      # (A,)
    adver_score = base_scores[:, :n_classes]                            # (A, K)

    onehot_b = onehot[:, None, :]                                       # (A, 1, Kp)

    def draw_batch(carry, i):
        grad_acc, loss_acc = carry
        k = jax.random.fold_in(key, i)
        # torch.randn replaced by deterministic jax.random; only +half materialized.
        half = jax.random.normal(k, (A, half_size, F), jnp.float32)
        scores_p, scores_m = fused_scores_pallas(x2d, half, w_pad, b_pad, sigma)
        loss_p = _margin_loss(scores_p * inv_eot, onehot_b)             # (A, Sh)
        loss_m = _margin_loss(scores_m * inv_eot, onehot_b)             # (A, Sh)
        g = grad_sum_pallas(loss_p - loss_m, half)                      # (A, F)
        loss_acc = loss_acc + loss_p.sum(-1) + loss_m.sum(-1)
        return (grad_acc + g, loss_acc), None

    init = (jnp.zeros((A, F), jnp.float32), jnp.zeros((A,), jnp.float32))
    (grad_sum, loss_sum), _ = jax.lax.scan(draw_batch, init, jnp.arange(num_batches))

    # Deferred scales: per-batch mean over samples (/batch_size), /sigma, /num_batches.
    grad = grad_sum.reshape(A, C, N) * (1.0 / (batch_size * sigma * num_batches))
    mean_loss = loss_sum * (1.0 / (batch_size * num_batches))
    return mean_loss, grad, adver_loss, adver_score


class NES:
    def __init__(self, samples_per_draw, samples_per_draw_batch, sigma, EOT_wrapper):
        self.samples_per_draw = samples_per_draw
        self.samples_per_draw_batch_size = samples_per_draw_batch
        self.sigma = sigma
        self.EOT_wrapper = EOT_wrapper
        eot_num_batches = int(EOT_wrapper.EOT_size // EOT_wrapper.EOT_batch_size)
        # One jit'ed function for the whole draw loop: no per-batch host syncs.
        self._core = jax.jit(functools.partial(
            _nes_core,
            sigma=float(sigma),
            samples_per_draw=int(samples_per_draw),
            batch_size=int(samples_per_draw_batch),
            eot_num_batches=eot_num_batches,
            n_classes=int(EOT_wrapper.n_classes)))

    def forward(self, x, y, noise_key):
        y_dev = jnp.asarray(np.asarray(y), dtype=jnp.int32)
        mean_loss, grad, adver_loss, adver_score = self._core(
            x, y_dev, self.EOT_wrapper.W_padded, self.EOT_wrapper.b_padded, noise_key)
        # Only the zero-noise sample's decision is consumed by the reference code
        # (predicts[:, 0]); fetch it once here instead of syncing every draw batch.
        decisions = np.asarray(jax.device_get(jnp.argmax(adver_score, axis=-1)))
        decisions = decisions.reshape(-1, 1)      # one column per EOT batch (== 1)
        predict = resolve_prediction(decisions)
        return mean_loss, grad, adver_loss, adver_score, predict


if __name__ == "__main__":
    key = jax.random.PRNGKey(0)
    k_x, k_wrap, k_noise = jax.random.split(key, 3)

    n_audios, n_channels, N = 2, 1, 1024            # small, lane-aligned audio length
    n_classes = 10
    samples_per_draw, samples_per_draw_batch, sigma = 16, 8, 1e-3

    x = jax.random.normal(k_x, (n_audios, n_channels, N), jnp.float32)
    y = np.array([3, 7], dtype=np.int64)

    eot = SyntheticEOTWrapper(n_channels, N, n_classes, k_wrap)
    nes = NES(samples_per_draw, samples_per_draw_batch, sigma, eot)

    mean_loss, grad, adver_loss, adver_score, predict = nes.forward(x, y, k_noise)
    jax.block_until_ready((mean_loss, grad, adver_loss, adver_score))

    assert mean_loss.shape == (n_audios,)
    assert grad.shape == (n_audios, n_channels, N)
    assert adver_loss.shape == (n_audios,)
    assert adver_score.shape == (n_audios, n_classes)
    assert predict.shape == (n_audios,)
    assert np.all(np.isfinite(np.asarray(jax.device_get(mean_loss))))
    assert np.all(np.isfinite(np.asarray(jax.device_get(grad))))
    print("KERNEL_OK")
</pallas_src>

<mosaic_0001>
module attributes {stable_mosaic.version = 11 : i64} {
  func.func @_fused_scores_kernel(%arg0: i32, %arg1: i32, %arg2: memref<1x1x512xf32, #tpu.memory_space<vmem>>, %arg3: memref<1x4x512xf32, #tpu.memory_space<vmem>>, %arg4: memref<512x128xf32, #tpu.memory_space<vmem>>, %arg5: memref<1x128xf32, #tpu.memory_space<vmem>>, %arg6: memref<1x4x128xf32, #tpu.memory_space<vmem>>, %arg7: memref<1x4x128xf32, #tpu.memory_space<vmem>>, %arg8: memref<4x128xf32, #tpu.memory_space<vmem>>, %arg9: memref<4x128xf32, #tpu.memory_space<vmem>>) attributes {dimension_semantics = [#tpu.dimension_semantics<parallel>, #tpu.dimension_semantics<arbitrary>], iteration_bounds = array<i64: 2, 2>, scalar_prefetch = 0 : i64, scratch_operands = 2 : i64, tpu.core_type = #tpu.core_type<tc>, window_params = [{transform_indices = @transform_0, window_bounds = array<i64: 1, 1, 512>}, {transform_indices = @transform_1, window_bounds = array<i64: 1, 4, 512>}, {transform_indices = @transform_2, window_bounds = array<i64: 512, 128>}, {pipeline_mode = #tpu.pipeline_mode<synchronous>, transform_indices = @transform_3, window_bounds = array<i64: 1, 128>}, {transform_indices = @transform_4, window_bounds = array<i64: 1, 4, 128>}, {transform_indices = @transform_5, window_bounds = array<i64: 1, 4, 128>}]} {
    %c0_i32 = arith.constant 0 : i32
    %0 = arith.cmpi eq, %arg1, %c0_i32 : i32
    %1 = arith.extui %0 : i1 to i32
    %c0_i32_0 = arith.constant 0 : i32
    %2 = arith.cmpi ne, %1, %c0_i32_0 : i32
    scf.if %2 {
      %cst_19 = arith.constant 0.000000e+00 : f32
      %25 = vector.broadcast %cst_19 : f32 to vector<4x128xf32>
      %c0_20 = arith.constant 0 : index
      %c0_21 = arith.constant 0 : index
      %26 = vector.load %arg8[%c0_20, %c0_21] : memref<4x128xf32, #tpu.memory_space<vmem>>, vector<4x128xf32>
      tpu.vector_store %arg8[%c0_20, %c0_21], %25 {strides = array<i32>} : memref<4x128xf32, #tpu.memory_space<vmem>>, vector<4x128xf32>,
      %cst_22 = arith.constant 0.000000e+00 : f32
      %27 = vector.broadcast %cst_22 : f32 to vector<4x128xf32>
      %c0_23 = arith.constant 0 : index
      %c0_24 = arith.constant 0 : index
      %28 = vector.load %arg9[%c0_23, %c0_24] : memref<4x128xf32, #tpu.memory_space<vmem>>, vector<4x128xf32>
      tpu.vector_store %arg9[%c0_23, %c0_24], %27 {strides = array<i32>} : memref<4x128xf32, #tpu.memory_space<vmem>>, vector<4x128xf32>,
    } else {
    }
    %c0 = arith.constant 0 : index
    %c0_1 = arith.constant 0 : index
    %c0_2 = arith.constant 0 : index
    %3 = vector.load %arg2[%c0, %c0_1, %c0_2] : memref<1x1x512xf32, #tpu.memory_space<vmem>>, vector<1x1x512xf32>
    %4 = vector.shape_cast %3 : vector<1x1x512xf32> to vector<1x512xf32>
    %c0_3 = arith.constant 0 : index
    %c0_4 = arith.constant 0 : index
    %c0_5 = arith.constant 0 : index
    %5 = vector.load %arg3[%c0_3, %c0_4, %c0_5] : memref<1x4x512xf32, #tpu.memory_space<vmem>>, vector<1x4x512xf32>
    %6 = vector.shape_cast %5 : vector<1x4x512xf32> to vector<4x512xf32>
    %c0_6 = arith.constant 0 : index
    %c0_7 = arith.constant 0 : index
    %7 = vector.load %arg4[%c0_6, %c0_7] : memref<512x128xf32, #tpu.memory_space<vmem>>, vector<512x128xf32>
    %cst = arith.constant 1.000000e-03 : f32
    %8 = vector.broadcast %cst : f32 to vector<4x512xf32>
    %9 = arith.mulf %6, %8 : vector<4x512xf32>
    %10 = vector.broadcast %4 : vector<1x512xf32> to vector<4x512xf32>
    %11 = arith.addf %9, %10 : vector<4x512xf32>
    %12 = vector.broadcast %4 : vector<1x512xf32> to vector<4x512xf32>
    %13 = arith.subf %12, %9 : vector<4x512xf32>
    %c0_8 = arith.constant 0 : index
    %c0_9 = arith.constant 0 : index
    %14 = vector.load %arg8[%c0_8, %c0_9] : memref<4x128xf32, #tpu.memory_space<vmem>>, vector<4x128xf32>
    %cst_10 = arith.constant dense<0.000000e+00> : vector<4x128xf32>
    %15 = tpu.matmul %11, %7, %cst_10 {dimension_numbers = #tpu.dot_dimension_numbers<[1], [0], [0], [1], [0, 0, 1, 1], [], []>} : vector<4x512xf32>, vector<512x128xf32>, vector<4x128xf32> -> vector<4x128xf32>
    %16 = arith.addf %14, %15 : vector<4x128xf32>
    %c0_11 = arith.constant 0 : index
    %c0_12 = arith.constant 0 : index
    %17 = vector.load %arg8[%c0_11, %c0_12] : memref<4x128xf32, #tpu.memory_space<vmem>>, vector<4x128xf32>
    tpu.vector_store %arg8[%c0_11, %c0_12], %16 {strides = array<i32>} : memref<4x128xf32, #tpu.memory_space<vmem>>, vector<4x128xf32>,
    %c0_13 = arith.constant 0 : index
    %c0_14 = arith.constant 0 : index
    %18 = vector.load %arg9[%c0_13, %c0_14] : memref<4x128xf32, #tpu.memory_space<vmem>>, vector<4x128xf32>
    %cst_15 = arith.constant dense<0.000000e+00> : vector<4x128xf32>
    %19 = tpu.matmul %13, %7, %cst_15 {dimension_numbers = #tpu.dot_dimension_numbers<[1], [0], [0], [1], [0, 0, 1, 1], [], []>} : vector<4x512xf32>, vector<512x128xf32>, vector<4x128xf32> -> vector<4x128xf32>
    %20 = arith.addf %18, %19 : vector<4x128xf32>
    %c0_16 = arith.constant 0 : index
    %c0_17 = arith.constant 0 : index
    %21 = vector.load %arg9[%c0_16, %c0_17] : memref<4x128xf32, #tpu.memory_space<vmem>>, vector<4x128xf32>
    tpu.vector_store %arg9[%c0_16, %c0_17], %20 {strides = array<i32>} : memref<4x128xf32, #tpu.memory_space<vmem>>, vector<4x128xf32>,
    %c1_i32 = arith.constant 1 : i32
    %22 = arith.cmpi eq, %arg1, %c1_i32 : i32
    %23 = arith.extui %22 : i1 to i32
    %c0_i32_18 = arith.constant 0 : i32
    %24 = arith.cmpi ne, %23, %c0_i32_18 : i32
    scf.if %24 {
      %c0_19 = arith.constant 0 : index
      %c0_20 = arith.constant 0 : index
      %25 = vector.load %arg5[%c0_19, %c0_20] : memref<1x128xf32, #tpu.memory_space<vmem>>, vector<1x128xf32>
      %c0_21 = arith.constant 0 : index
      %c0_22 = arith.constant 0 : index
      %26 = vector.load %arg8[%c0_21, %c0_22] : memref<4x128xf32, #tpu.memory_space<vmem>>, vector<4x128xf32>
      %27 = vector.broadcast %25 : vector<1x128xf32> to vector<4x128xf32>
      %28 = arith.addf %26, %27 : vector<4x128xf32>
      %29 = vector.shape_cast %28 : vector<4x128xf32> to vector<1x4x128xf32>
      %c0_23 = arith.constant 0 : index
      %c0_24 = arith.constant 0 : index
      %c0_25 = arith.constant 0 : index
      %30 = vector.load %arg6[%c0_23, %c0_24, %c0_25] : memref<1x4x128xf32, #tpu.memory_space<vmem>>, vector<1x4x128xf32>
      tpu.vector_store %arg6[%c0_23, %c0_24, %c0_25], %29 {strides = array<i32>} : memref<1x4x128xf32, #tpu.memory_space<vmem>>, vector<1x4x128xf32>,
      %c0_26 = arith.constant 0 : index
      %c0_27 = arith.constant 0 : index
      %31 = vector.load %arg9[%c0_26, %c0_27] : memref<4x128xf32, #tpu.memory_space<vmem>>, vector<4x128xf32>
      %32 = vector.broadcast %25 : vector<1x128xf32> to vector<4x128xf32>
      %33 = arith.addf %31, %32 : vector<4x128xf32>
      %34 = vector.shape_cast %33 : vector<4x128xf32> to vector<1x4x128xf32>
      %c0_28 = arith.constant 0 : index
      %c0_29 = arith.constant 0 : index
      %c0_30 = arith.constant 0 : index
      %35 = vector.load %arg7[%c0_28, %c0_29, %c0_30] : memref<1x4x128xf32, #tpu.memory_space<vmem>>, vector<1x4x128xf32>
      tpu.vector_store %arg7[%c0_28, %c0_29, %c0_30], %34 {strides = array<i32>} : memref<1x4x128xf32, #tpu.memory_space<vmem>>, vector<1x4x128xf32>,
    } else {
    }
    return
  }
  func.func @transform_0(%arg0: i32, %arg1: i32) -> (i32, i32, i32) {
    %c0_i32 = arith.constant 0 : i32
    %c0_i32_0 = arith.constant 0 : i32
    return %arg0, %c0_i32, %arg1 : i32, i32, i32
  }
  func.func @transform_1(%arg0: i32, %arg1: i32) -> (i32, i32, i32) {
    %c0_i32 = arith.constant 0 : i32
    %c0_i32_0 = arith.constant 0 : i32
    return %arg0, %c0_i32, %arg1 : i32, i32, i32
  }
  func.func @transform_2(%arg0: i32, %arg1: i32) -> (i32, i32) {
    %c0_i32 = arith.constant 0 : i32
    %c0_i32_0 = arith.constant 0 : i32
    return %arg1, %c0_i32 : i32, i32
  }
  func.func @transform_3(%arg0: i32, %arg1: i32) -> (i32, i32) {
    %c0_i32 = arith.constant 0 : i32
    %c0_i32_0 = arith.constant 0 : i32
    %c0_i32_1 = arith.constant 0 : i32
    return %c0_i32, %c0_i32_0 : i32, i32
  }
  func.func @transform_4(%arg0: i32, %arg1: i32) -> (i32, i32, i32) {
    %c0_i32 = arith.constant 0 : i32
    %c0_i32_0 = arith.constant 0 : i32
    %c0_i32_1 = arith.constant 0 : i32
    return %arg0, %c0_i32, %c0_i32_0 : i32, i32, i32
  }
  func.func @transform_5(%arg0: i32, %arg1: i32) -> (i32, i32, i32) {
    %c0_i32 = arith.constant 0 : i32
    %c0_i32_0 = arith.constant 0 : i32
    %c0_i32_1 = arith.constant 0 : i32
    return %arg0, %c0_i32, %c0_i32_0 : i32, i32, i32
  }
}

module attributes {stable_mosaic.version = 11 : i64} {
  func.func @_grad_sum_kernel(%arg0: i32, %arg1: i32, %arg2: memref<1x1x4xf32, #tpu.memory_space<vmem>>, %arg3: memref<1x4x512xf32, #tpu.memory_space<vmem>>, %arg4: memref<1x1x512xf32, #tpu.memory_space<vmem>>) attributes {dimension_semantics = [#tpu.dimension_semantics<parallel>, #tpu.dimension_semantics<parallel>], iteration_bounds = array<i64: 2, 2>, scalar_prefetch = 0 : i64, scratch_operands = 0 : i64, tpu.core_type = #tpu.core_type<tc>, window_params = [{transform_indices = @transform_0, window_bounds = array<i64: 1, 1, 4>}, {transform_indices = @transform_1, window_bounds = array<i64: 1, 4, 512>}, {transform_indices = @transform_2, window_bounds = array<i64: 1, 1, 512>}]} {
    %c0 = arith.constant 0 : index
    %c0_0 = arith.constant 0 : index
    %c0_1 = arith.constant 0 : index
    %0 = vector.load %arg2[%c0, %c0_0, %c0_1] : memref<1x1x4xf32, #tpu.memory_space<vmem>>, vector<1x1x4xf32>
    %1 = vector.shape_cast %0 : vector<1x1x4xf32> to vector<1x4xf32>
    %c0_2 = arith.constant 0 : index
    %c0_3 = arith.constant 0 : index
    %c0_4 = arith.constant 0 : index
    %2 = vector.load %arg3[%c0_2, %c0_3, %c0_4] : memref<1x4x512xf32, #tpu.memory_space<vmem>>, vector<1x4x512xf32>
    %3 = vector.shape_cast %2 : vector<1x4x512xf32> to vector<4x512xf32>
    %cst = arith.constant dense<0.000000e+00> : vector<1x512xf32>
    %4 = tpu.matmul %1, %3, %cst {dimension_numbers = #tpu.dot_dimension_numbers<[1], [0], [0], [1], [0, 0, 1, 1], [], []>} : vector<1x4xf32>, vector<4x512xf32>, vector<1x512xf32> -> vector<1x512xf32>
    %5 = vector.shape_cast %4 : vector<1x512xf32> to vector<1x1x512xf32>
    %c0_5 = arith.constant 0 : index
    %c0_6 = arith.constant 0 : index
    %c0_7 = arith.constant 0 : index
    %6 = vector.load %arg4[%c0_5, %c0_6, %c0_7] : memref<1x1x512xf32, #tpu.memory_space<vmem>>, vector<1x1x512xf32>
    tpu.vector_store %arg4[%c0_5, %c0_6, %c0_7], %5 {strides = array<i32>} : memref<1x1x512xf32, #tpu.memory_space<vmem>>, vector<1x1x512xf32>,
    return
  }
  func.func @transform_0(%arg0: i32, %arg1: i32) -> (i32, i32, i32) {
    %c0_i32 = arith.constant 0 : i32
    %c0_i32_0 = arith.constant 0 : i32
    %c0_i32_1 = arith.constant 0 : i32
    return %arg0, %c0_i32, %c0_i32_0 : i32, i32, i32
  }
  func.func @transform_1(%arg0: i32, %arg1: i32) -> (i32, i32, i32) {
    %c0_i32 = arith.constant 0 : i32
    %c0_i32_0 = arith.constant 0 : i32
    return %arg0, %c0_i32, %arg1 : i32, i32, i32
  }
  func.func @transform_2(%arg0: i32, %arg1: i32) -> (i32, i32, i32) {
    %c0_i32 = arith.constant 0 : i32
    %c0_i32_0 = arith.constant 0 : i32
    return %arg0, %c0_i32, %arg1 : i32, i32, i32
  }
}

module attributes {stable_mosaic.version = 11 : i64} {
  func.func @_base_scores_kernel(%arg0: i32, %arg1: memref<2x512xf32, #tpu.memory_space<vmem>>, %arg2: memref<512x128xf32, #tpu.memory_space<vmem>>, %arg3: memref<1x128xf32, #tpu.memory_space<vmem>>, %arg4: memref<2x128xf32, #tpu.memory_space<vmem>>, %arg5: memref<2x128xf32, #tpu.memory_space<vmem>>) attributes {dimension_semantics = [#tpu.dimension_semantics<arbitrary>], iteration_bounds = array<i64: 2>, scalar_prefetch = 0 : i64, scratch_operands = 1 : i64, tpu.core_type = #tpu.core_type<tc>, window_params = [{transform_indices = @transform_0, window_bounds = array<i64: 2, 512>}, {transform_indices = @transform_1, window_bounds = array<i64: 512, 128>}, {pipeline_mode = #tpu.pipeline_mode<synchronous>, transform_indices = @transform_2, window_bounds = array<i64: 1, 128>}, {pipeline_mode = #tpu.pipeline_mode<synchronous>, transform_indices = @transform_3, window_bounds = array<i64: 2, 128>}]} {
    %c0_i32 = arith.constant 0 : i32
    %0 = arith.cmpi eq, %arg0, %c0_i32 : i32
    %1 = arith.extui %0 : i1 to i32
    %c0_i32_0 = arith.constant 0 : i32
    %2 = arith.cmpi ne, %1, %c0_i32_0 : i32
    scf.if %2 {
      %cst_9 = arith.constant 0.000000e+00 : f32
      %12 = vector.broadcast %cst_9 : f32 to vector<2x128xf32>
      %c0_10 = arith.constant 0 : index
      %c0_11 = arith.constant 0 : index
      %13 = vector.load %arg5[%c0_10, %c0_11] : memref<2x128xf32, #tpu.memory_space<vmem>>, vector<2x128xf32>
      tpu.vector_store %arg5[%c0_10, %c0_11], %12 {strides = array<i32>} : memref<2x128xf32, #tpu.memory_space<vmem>>, vector<2x128xf32>,
    } else {
    }
    %c0 = arith.constant 0 : index
    %c0_1 = arith.constant 0 : index
    %3 = vector.load %arg5[%c0, %c0_1] : memref<2x128xf32, #tpu.memory_space<vmem>>, vector<2x128xf32>
    %c0_2 = arith.constant 0 : index
    %c0_3 = arith.constant 0 : index
    %4 = vector.load %arg1[%c0_2, %c0_3] : memref<2x512xf32, #tpu.memory_space<vmem>>, vector<2x512xf32>
    %c0_4 = arith.constant 0 : index
    %c0_5 = arith.constant 0 : index
    %5 = vector.load %arg2[%c0_4, %c0_5] : memref<512x128xf32, #tpu.memory_space<vmem>>, vector<512x128xf32>
    %cst = arith.constant dense<0.000000e+00> : vector<2x128xf32>
    %6 = tpu.matmul %4, %5, %cst {dimension_numbers = #tpu.dot_dimension_numbers<[1], [0], [0], [1], [0, 0, 1, 1], [], []>} : vector<2x512xf32>, vector<512x128xf32>, vector<2x128xf32> -> vector<2x128xf32>
    %7 = arith.addf %3, %6 : vector<2x128xf32>
    %c0_6 = arith.constant 0 : index
    %c0_7 = arith.constant 0 : index
    %8 = vector.load %arg5[%c0_6, %c0_7] : memref<2x128xf32, #tpu.memory_space<vmem>>, vector<2x128xf32>
    tpu.vector_store %arg5[%c0_6, %c0_7], %7 {strides = array<i32>} : memref<2x128xf32, #tpu.memory_space<vmem>>, vector<2x128xf32>,
    %c1_i32 = arith.constant 1 : i32
    %9 = arith.cmpi eq, %arg0, %c1_i32 : i32
    %10 = arith.extui %9 : i1 to i32
    %c0_i32_8 = arith.constant 0 : i32
    %11 = arith.cmpi ne, %10, %c0_i32_8 : i32
    scf.if %11 {
      %c0_9 = arith.constant 0 : index
      %c0_10 = arith.constant 0 : index
      %12 = vector.load %arg5[%c0_9, %c0_10] : memref<2x128xf32, #tpu.memory_space<vmem>>, vector<2x128xf32>
      %c0_11 = arith.constant 0 : index
      %c0_12 = arith.constant 0 : index
      %13 = vector.load %arg3[%c0_11, %c0_12] : memref<1x128xf32, #tpu.memory_space<vmem>>, vector<1x128xf32>
      %14 = vector.broadcast %13 : vector<1x128xf32> to vector<2x128xf32>
      %15 = arith.addf %12, %14 : vector<2x128xf32>
      %c0_13 = arith.constant 0 : index
      %c0_14 = arith.constant 0 : index
      %16 = vector.load %arg4[%c0_13, %c0_14] : memref<2x128xf32, #tpu.memory_space<vmem>>, vector<2x128xf32>
      tpu.vector_store %arg4[%c0_13, %c0_14], %15 {strides = array<i32>} : memref<2x128xf32, #tpu.memory_space<vmem>>, vector<2x128xf32>,
    } else {
    }
    return
  }
  func.func @transform_0(%arg0: i32) -> (i32, i32) {
    %c0_i32 = arith.constant 0 : i32
    %c0_i32_0 = arith.constant 0 : i32
    return %c0_i32, %arg0 : i32, i32
  }
  func.func @transform_1(%arg0: i32) -> (i32, i32) {
    %c0_i32 = arith.constant 0 : i32
    %c0_i32_0 = arith.constant 0 : i32
    return %arg0, %c0_i32 : i32, i32
  }
  func.func @transform_2(%arg0: i32) -> (i32, i32) {
    %c0_i32 = arith.constant 0 : i32
    %c0_i32_0 = arith.constant 0 : i32
    %c0_i32_1 = arith.constant 0 : i32
    return %c0_i32, %c0_i32_0 : i32, i32
  }
  func.func @transform_3(%arg0: i32) -> (i32, i32) {
    %c0_i32 = arith.constant 0 : i32
    %c0_i32_0 = arith.constant 0 : i32
    %c0_i32_1 = arith.constant 0 : i32
    return %c0_i32, %c0_i32_0 : i32, i32
  }
}

</mosaic_0001>

<bundles_post_ra>
// kernel: custom-call
= control target key start
LH: loop header
LB: loop body
LE: loop exit
PB: predicated region body
PF: predicated region fallthrough
CT: control target
= control target key end

     0   :  { %s6_s0 = inlined_call_operand.vmem [shape: f32[2,1024], index: 0, kind: output, shape index: {}]  }

// kernel: custom-call.1
= control target key start
LH: loop header
LB: loop body
LE: loop exit
PB: predicated region body
PF: predicated region fallthrough
CT: control target
= control target key end

     0   :  { %s6_s0 = inlined_call_operand.vmem [shape: f32[2], index: 0, kind: output, shape index: {}]  }

// kernel: closed_call.21
= control target key start
LH: loop header
LB: loop body
LE: loop exit
PB: predicated region body
PF: predicated region fallthrough
CT: control target
= control target key end

     0   :  { %s527_s9 = smov 0   ;;  %s529_s10 = smov 0   ;;  %s585_s0 = inlined_call_operand.vmem [shape: f32[2,1,4], index: 0, kind: input, shape index: {}]   ;;  %s586_s1 = inlined_call_operand.vmem [shape: f32[2,4,1024], index: 1, kind: input, shape index: {}]   ;;  %s587_s2 = inlined_call_operand.vmem [shape: f32[2,1,1024], index: 2, kind: output, shape index: {}]  }
   0x1   :  { %s531_s11 = smov 0   ;;  %s533_s12 = smov 0  }
   0x2   :  { %s535_s13 = smov 0  }
   0x3 LB: > { %s21_s14 = sadd.s32 1, %s502_s11  ;;  %s24_s15 = sadd.s32 1, %s506_s12  ;;  %s510_s13 = sphi %s535_s13, %s12_s13   ;;  %s506_s12 = sphi %s533_s12, %s591_s12   ;;  %s502_s11 = sphi %s531_s11, %s590_s11   ;;  %s498_s10 = sphi %s529_s10, %s589_s10   ;;  %s494_s9 = sphi %s527_s9, %s588_s9  }
   0x4   : > { %p22_p0 = scmp.ge.s32.totalorder %s21_s14, 2  ;;  %p416_p1 = scmp.ge.s32.totalorder %s510_s13, 1 }
   0x5   : > { %p141_p2 = scmp.lt.s32.totalorder %s510_s13, 5 }
   0x6   : > { %s593_s14 = smov (%p22_p0, %s21_s14), 0  ;;  %s595_s15 = smov (!%p22_p0, %s24_s15), %s506_s12 }
   0x7   : > { %p142_p3 = pnand %p416_p1, %p141_p2  ;;  %p26_p4 = scmp.ge.s32.totalorder %s595_s15, 2 }
   0x8   : > { %p173_p5 = scmp.lt.s32.totalorder (!%p142_p3), %s498_s10, 1  ;;  %s417_s16 = sshll.u32 (!%p142_p3), %s494_s9, 2 }
   0x9   : > { %s597_s15 = smov (%p26_p4, %s595_s15), 0  ;;  %145 = sbr.rel (%p142_p3) target bundleno = 166 (0xa6), region = 28 }
   0xa   : > { %p179_p6 = scmp.lt.s32.totalorder (!%p142_p3), %s417_s16, 7 }
   0xe   : > { %s599_s10 = smov (!%p173_p5, %s498_s10), 1  ;;  %s601_s16 = smov (!%p179_p6, %s417_s16), 7  ;;  %vm211_vm0 = vcmask 1043456   ;;  %vm207_vm1 = vcmask 31744   ;;  %vm307_vm2 = vcmask 1040384   ;;  %v314_v10 = vlaneseq }
   0xf   : > { %s418_s17 = sshll.u32 %s599_s10, 3  ;;  %s175_s25 = scalar_lea.vmem %s585_s0, %s599_s10  ;;  %vm309_vm3 = vcmask 1042434   ;;  %vm311_vm4 = vcmask 1041408  }
  0x10   : > { %s557_s18 = sadd.s32 %s418_s17, %s601_s16  ;;  %v195_v2 = vld [vmem:[%s175_s25] sm:$0x1]  ;;  %vm316_vm5 = vcmp.lt.s32.totalorder %v314_v10, 512 }
  0x11   : > { %s419_s19 = sshll.u32 %s557_s18, 2  ;;  %s193_s28 = scalar_lea.vmem %s587_s2, %s557_s18 }
  0x12   : > { %s184_s22 = scalar_lea.vmem %s586_s1, %s419_s19 }
  0x13   : > { %v197_v0 = vld [vmem:[%s184_s22 + $0x8] sm:$0xff]  ;;  %v196_v1 = vld [vmem:[%s184_s22] sm:$0xff] }
  0x14   : > { %202 = vst [vmem:[#allocation1 + $0x10] ss:$2 sm:$0xff] %v197_v0 }
  0x15   : > { %200 = vst [vmem:[#allocation1] ss:$2 sm:$0xff] %v196_v1 }
  0x1b   : > { %v205_v3 = vld.sshfl [vmem:[#allocation1 + $0x10] sm:$0xff pattern:$0x75316420]  ;;  %v206_v4 = vld.sshfl [vmem:[#allocation1 + $0x18] sm:$0xff pattern:$0x75316420] }
  0x1c   : > { %426 = vmatpush.msk.msra.mxu2 %vm211_vm0, %v205_v3  ;;  %428 = vmatpush.msk.msra.mxu3 %vm211_vm0, %v206_v4  ;;  %v204_v5 = vld.sshfl [vmem:[#allocation1 + $0x8] sm:$0xff pattern:$0x75316420]  ;;  %v203_v6 = vld.sshfl [vmem:[#allocation1] sm:$0xff pattern:$0x75316420] }
  0x1d   : > { %427 = vmatmul.msk.f32.vlgmr.msra.gmra.mxu2 %vm207_vm1, %v195_v2  ;;  %429 = vmatmul.msk.f32.vlgmr.msra.gmra.mxu3 %vm207_vm1, %v195_v2 }
  0x1e   : > { %424 = vmatpush.msk.msra.mxu1 %vm211_vm0, %v204_v5  ;;  %422 = vmatpush.msk.msra.mxu0 %vm211_vm0, %v203_v6 }
  0x1f   : > { %425 = vmatmul.msk.f32.vlgmr.msra.gmra.mxu1 %vm207_vm1, %v195_v2  ;;  %423 = vmatmul.msk.f32.vlgmr.msra.gmra.mxu0 %vm207_vm1, %v195_v2 }
  0x9c   : > { %v257_v7 = vpop.f32.mrf.mxu1  ;;  %v237_v9 = vpop.f32.mrf.mxu0 }
  0x9d   : > { %v304_v8 = vrot.slane %v257_v7, 7 }
  0x9f   : > { %v308_v15 = vsel %vm307_vm2, %v237_v9, %v304_v8 }
  0xa0   : > { %v277_v11 = vpop.f32.mrf.mxu2  ;;  %v297_v12 = vpop.f32.mrf.mxu3 }
  0xa1   : > { %v305_v13 = vrot.slane %v277_v11, 6  ;;  %v306_v14 = vrot.slane %v297_v12, 5 }
  0xa3   : > { %v310_v16 = vsel %vm309_vm3, %v305_v13, %v306_v14 }
  0xa4   : > { %v312_v17 = vsel %vm311_vm4, %v308_v15, %v310_v16 }
  0xa5   : > { %318 = vst.msk [vmem:[%s193_s28] sm:$0xf] %vm316_vm5, %v312_v17 }
  0xa6 PF: > { %s12_s13 = sadd.s32 1, %s510_s13   ;;  %s588_s9 = smov %s502_s11 }
  0xa7   : > { %p9_p7 = scmp.ge.s32.totalorder %s12_s13, 6   ;;  %s589_s10 = smov %s506_s12 }
  0xa8   : > { %s590_s11 = smov %s593_s14  ;;  %s591_s12 = smov %s597_s15 }
  0xa9   :  { %11 = sbr.rel (!%p9_p7) target bundleno = 3 (0x3), region = 62 }

// kernel: closed_call.20
= control target key start
LH: loop header
LB: loop body
LE: loop exit
PB: predicated region body
PF: predicated region fallthrough
CT: control target
= control target key end

     0   :  { %11 = vsyncpa [#allocation5], 0  ;;  %s1508_s0 = inlined_call_operand.vmem [shape: f32[2,1,1024], index: 0, kind: input, shape index: {}]   ;;  %s1509_s1 = inlined_call_operand.vmem [shape: f32[2,4,1024], index: 1, kind: input, shape index: {}]   ;;  %s1510_s2 = inlined_call_operand.hbm [shape: f32[1024,128], index: 2, kind: input, shape index: {}]   ;;  %s1511_s3 = inlined_call_operand.vmem [shape: f32[1,128], index: 3, kind: input, shape index: {}]   ;;  %s1512_s4 = inlined_call_operand.vmem [shape: f32[2,4,128], index: 4, kind: output, shape index: {0}]   ;;  %s1513_s5 = inlined_call_operand.vmem [shape: f32[2,4,128], index: 5, kind: output, shape index: {1}]  }
   0x1   :  { %13 = vsyncpa [#allocation5 + $0x1], 0  ;;  %s1008_s18 = smov 0   ;;  %s1010_s19 = smov 0  }
   0x2   :  { %s1012_s20 = smov 0   ;;  %s1014_s21 = smov 0  }
   0x3   :  { %s1016_s22 = smov 0   ;;  %s1018_s23 = smov 0  }
   0x4   :  { %s1020_s24 = smov 0   ;;  %s1022_s25 = smov 0  }
   0x5 LB: > { %s781_s26 = sadd.s32 4294967295, %s973_s25   ;;  %s28_s27 = sadd.s32 1, %s965_s23  ;;  %s973_s25 = sphi %s1022_s25, %s19_s25   ;;  %s969_s24 = sphi %s1020_s24, %s1554_s24   ;;  %s965_s23 = sphi %s1018_s23, %s1553_s23   ;;  %s961_s22 = sphi %s1016_s22, %s1552_s22   ;;  %s957_s21 = sphi %s1014_s21, %s1551_s21   ;;  %s953_s20 = sphi %s1012_s20, %s1550_s20   ;;  %s949_s19 = sphi %s1010_s19, %s1549_s19   ;;  %s945_s18 = sphi %s1008_s18, %s1548_s18  }
   0x6   : > { %p29_p0 = scmp.ge.s32.totalorder %s28_s27, 2  ;;  %s31_s28 = sadd.s32 1, %s969_s24 }
   0x7   : > { %s94_s29 = sadd.s32 1, %s953_s20  ;;  %p101_p1 = scmp.ne.s32.totalorder %s953_s20, %s949_s19 }
   0x8   : > { %s1556_s27 = smov (%p29_p0, %s28_s27), 0  ;;  %s1558_s28 = smov (!%p29_p0, %s31_s28), %s969_s24 }
   0x9   : > { %s91_s30 = ssub.s32 %s965_s23, %s1556_s27  ;;  %p102_p2 = scmp.eq.s32.totalorder %s973_s25, 0 }
   0xa   : > { %p33_p3 = scmp.ge.s32.totalorder %s1558_s28, 2  ;;  %p92_p4 = scmp.eq.s32.totalorder %s91_s30, 0 }
   0xb   : > { %p1058_p5 = por %p102_p2, %p101_p1  ;;  %p107_p6 = scmp.ne.s32.totalorder %s949_s19, %s945_s18 }
   0xc   : > { %s1560_s28 = smov (%p33_p3, %s1558_s28), 0  ;;  %p108_p7 = scmp.eq.s32.totalorder %s781_s26, 0 }
   0xd   : > { %s1066_s7 = scalar_select %p92_p4, %s953_s20, %s94_s29  }
   0xe   : > { %p808_p8 = scmp.lt.s32.totalorder %s973_s25, 4  ;;  %s232_s8 = sand.u32 1, %s953_s20  }
   0xf   : > { %p1070_p9 = por %p108_p7, %p107_p6  ;;  %s785_s10 = sshll.u32 %s232_s8, 9 }
  0x10   : > { %s801_s11 = sshll.u32 %s965_s23, 9  ;;  %s236_s16 = scalar_lea.vmem [#allocation4], %s785_s10 }
  0x11   : > { %s241_s14 = scalar_lea.hbm %s1510_s2, %s801_s11  ;;  %s244_s17 = sshll.u32 %s236_s16, 4  ;;  %s245_s17 = int_to_ptr.vmem [resolvable:$true] %s244_s17 }
  0x12   : > { %s242_s15 = sshll.u32 %s241_s14, 4  ;;  %p805_p10 = pnand %p808_p8, %p1058_p5  ;;  %s243_s15 = int_to_ptr.hbm [resolvable:$true] %s242_s15 }
  0x13   : > { %p788_p11 = scmp.ge.s32.totalorder %s973_s25, 1  ;;  %p252_p12 = scmp.lt.s32.totalorder %s973_s25, 5 }
  0x14   : > { %s233_s18 = scalar_lea.sflag [#allocation5], %s232_s8  ;;  %s975_s26 = smov 128  }
  0x15   : > { %s976_s29 = smov 8   ;;  %p253_p13 = pnand %p788_p11, %p252_p12 }
  0x16   : > { %807 = dma.hbm_to_vmem [thread:$0]  (!%p805_p10), %s243_s15, 8192, %s245_s17, %s233_s18, %s975_s26, %s975_s26, %s976_s29  }
  0x17   : > { %256 = sbr.rel (%p253_p13) target bundleno = 262 (0x106), region = 36 }
  0x1c   : > { %s258_s30 = sand.u32 1, %s949_s19  }
  0x1d   : > { %s789_s12 = sshll.u32 %s258_s30, 9  ;;  %s259_s11 = scalar_lea.sflag [#allocation5], %s258_s30 }
  0x1e   : > { %s1083_s13 = scalar_lea.vmem [#allocation4], %s789_s12 }
  0x1f   : > { %940 = dma.done.wait (%p1070_p9), %s259_s11, 8192  }
  0x20   : > { %942 = vsyncadd (%p1070_p9), %s259_s11, 4294959104  ;;  %s790_s6 = sshll.u32 %s957_s21, 2  ;;  %p311_p0 = scmp.lt.s32.totalorder %s961_s22, 1 }
  0x21   : > { %p313_p1 = scmp.lt.s32.totalorder %s790_s6, 7  ;;  %p797_p2 = scmp.ne.s32.totalorder %s957_s21, 0 }
  0x22   : > { %s1562_s22 = smov (!%p311_p0, %s961_s22), 1 }
  0x23   : > { %s1564_s6 = smov (!%p313_p1, %s790_s6), 7  ;;  %s791_s8 = sshll.u32 %s1562_s22, 3 }
  0x24   : > { %s795_s10 = sshll.u32 %s1562_s22, 2  ;;  %s1092_s14 = sadd.s32 %s791_s8, %s1564_s6 }
  0x25   : > { %s1097_s17 = scalar_lea.vmem %s1512_s4, %s795_s10  ;;  %s317_s26 = scalar_lea.vmem %s1508_s0, %s1092_s14 }
  0x26   : > { %s794_s29 = sshll.u32 %s1092_s14, 2  ;;  %s1112_s8 = scalar_lea.vmem %s1513_s5, %s795_s10 }
  0x27   : > { %s1107_s11 = scalar_lea.vmem %s1509_s1, %s794_s29  ;;  %341 = sbr.rel (%p797_p2) target bundleno = 47 (0x2f), region = 44 }
  0x2c   : > { %v977_v0 = vmov 0.0  }
  0x2d   : > { %342 = vst [vmem:[#allocation2] sm:$0xf] %v977_v0 }
  0x2e   : > { %343 = vst [vmem:[#allocation3] sm:$0xf] %v977_v0 }
  0x2f PF: > { %v1116_v1 = vld [vmem:[%s1083_s13 + $0x178] sm:$0xff]  ;;  %v1119_v2 = vld [vmem:[%s1083_s13 + $0x170] sm:$0xff]  ;;  %v1133_v6 = vld [vmem:[%s1083_s13 + $0x168] sm:$0xff]  ;;  %vm424_vm0 = vcmask 1043456   ;;  %p798_p3 = scmp.ne.s32.totalorder %s957_s21, 1 }
  0x30   : > { %v1122_v3 = vld [vmem:[%s1083_s13 + $0x1f8] sm:$0xff]  ;;  %502 = vmatpush.msra.mxu2 %v1116_v1  ;;  %v1138_v7 = vld [vmem:[%s1083_s13 + $0x1f0] sm:$0xff]  ;;  %v1149_v10 = vld [vmem:[%s1083_s13 + $0x1e8] sm:$0xff] }
  0x31   : > { %522 = vmatpush.msra.mxu3 %v1122_v3  ;;  %v1127_v4 = vld [vmem:[%s1083_s13 + $0x78] sm:$0xff]  ;;  %v1141_v8 = vld [vmem:[%s1083_s13 + $0x70] sm:$0xff]  ;;  %v1152_v11 = vld [vmem:[%s1083_s13 + $0x68] sm:$0xff] }
  0x32   : > { %v1130_v5 = vld [vmem:[%s1083_s13 + $0xf8] sm:$0xff]  ;;  %462 = vmatpush.msra.mxu0 %v1127_v4  ;;  %v1144_v9 = vld [vmem:[%s1083_s13 + $0xf0] sm:$0xff]  ;;  %503 = vmatpush.msra.mxu2 %v1119_v2  ;;  %v1157_v12 = vld [vmem:[%s1083_s13 + $0x160] sm:$0xff] }
  0x33   : > { %482 = vmatpush.msra.mxu1 %v1130_v5  ;;  %523 = vmatpush.msra.mxu3 %v1138_v7  ;;  %v1160_v13 = vld [vmem:[%s1083_s13 + $0xe8] sm:$0xff]  ;;  %v1163_v14 = vld [vmem:[%s1083_s13 + $0x1e0] sm:$0xff]  ;;  %v1176_v17 = vld [vmem:[%s1083_s13 + $0x158] sm:$0xff] }
  0x34   : > { %463 = vmatpush.msra.mxu0 %v1141_v8  ;;  %504 = vmatpush.msra.mxu2 %v1133_v6  ;;  %v1168_v15 = vld [vmem:[%s1083_s13 + $0x60] sm:$0xff]  ;;  %v1179_v18 = vld [vmem:[%s1083_s13 + $0x1d8] sm:$0xff]  ;;  %v1192_v21 = vld [vmem:[%s1083_s13 + $0x150] sm:$0xff] }
  0x35   : > { %483 = vmatpush.msra.mxu1 %v1144_v9  ;;  %524 = vmatpush.msra.mxu3 %v1149_v10  ;;  %v1171_v16 = vld [vmem:[%s1083_s13 + $0xe0] sm:$0xff]  ;;  %v1184_v19 = vld [vmem:[%s1083_s13 + $0x58] sm:$0xff]  ;;  %v1195_v22 = vld [vmem:[%s1083_s13 + $0x1d0] sm:$0xff] }
  0x36   : > { %464 = vmatpush.msra.mxu0 %v1152_v11  ;;  %505 = vmatpush.msra.mxu2 %v1157_v12  ;;  %v1187_v20 = vld [vmem:[%s1083_s13 + $0xd8] sm:$0xff]  ;;  %v1200_v23 = vld [vmem:[%s1083_s13 + $0x50] sm:$0xff]  ;;  %v1208_v25 = vld [vmem:[%s1083_s13 + $0x148] sm:$0xff] }
  0x37   : > { %484 = vmatpush.msra.mxu1 %v1160_v13  ;;  %525 = vmatpush.msra.mxu3 %v1163_v14  ;;  %v1203_v24 = vld [vmem:[%s1083_s13 + $0xd0] sm:$0xff]  ;;  %v1211_v26 = vld [vmem:[%s1083_s13 + $0x1c8] sm:$0xff]  ;;  %v1224_v29 = vld [vmem:[%s1083_s13 + $0x140] sm:$0xff] }
  0x38   : > { %465 = vmatpush.msra.mxu0 %v1168_v15  ;;  %506 = vmatpush.msra.mxu2 %v1176_v17  ;;  %v1216_v27 = vld [vmem:[%s1083_s13 + $0x48] sm:$0xff]  ;;  %v1227_v30 = vld [vmem:[%s1083_s13 + $0x1c0] sm:$0xff]  ;;  %v1240_v33 = vld [vmem:[%s1083_s13 + $0x138] sm:$0xff] }
  0x39   : > { %485 = vmatpush.msra.mxu1 %v1171_v16  ;;  %526 = vmatpush.msra.mxu3 %v1179_v18  ;;  %v1219_v28 = vld [vmem:[%s1083_s13 + $0xc8] sm:$0xff]  ;;  %v1232_v31 = vld [vmem:[%s1083_s13 + $0x40] sm:$0xff]  ;;  %v1243_v34 = vld [vmem:[%s1083_s13 + $0x1b8] sm:$0xff] }
  0x3a   : > { %466 = vmatpush.msra.mxu0 %v1184_v19  ;;  %507 = vmatpush.msra.mxu2 %v1192_v21  ;;  %v1235_v32 = vld [vmem:[%s1083_s13 + $0xc0] sm:$0xff]  ;;  %v1248_v35 = vld [vmem:[%s1083_s13 + $0x38] sm:$0xff]  ;;  %v1256_v37 = vld [vmem:[%s1083_s13 + $0x130] sm:$0xff] }
  0x3b   : > { %486 = vmatpush.msra.mxu1 %v1187_v20  ;;  %527 = vmatpush.msra.mxu3 %v1195_v22  ;;  %v1251_v36 = vld [vmem:[%s1083_s13 + $0xb8] sm:$0xff]  ;;  %v1259_v38 = vld [vmem:[%s1083_s13 + $0x1b0] sm:$0xff]  ;;  %v1272_v41 = vld [vmem:[%s1083_s13 + $0x128] sm:$0xff] }
  0x3c   : > { %467 = vmatpush.msra.mxu0 %v1200_v23  ;;  %508 = vmatpush.msra.mxu2 %v1208_v25  ;;  %v1264_v39 = vld [vmem:[%s1083_s13 + $0x30] sm:$0xff]  ;;  %v1275_v42 = vld [vmem:[%s1083_s13 + $0x1a8] sm:$0xff]  ;;  %v1280_v43 = vld [vmem:[%s1083_s13 + $0x120] sm:$0xff] }
  0x3d   : > { %487 = vmatpush.msra.mxu1 %v1203_v24  ;;  %528 = vmatpush.msra.mxu3 %v1211_v26  ;;  %v1267_v40 = vld [vmem:[%s1083_s13 + $0xb0] sm:$0xff]  ;;  %v1283_v44 = vld [vmem:[%s1083_s13 + $0x28] sm:$0xff]  ;;  %v1291_v46 = vld [vmem:[%s1083_s13 + $0x118] sm:$0xff] }
  0x3e   : > { %468 = vmatpush.msra.mxu0 %v1216_v27  ;;  %509 = vmatpush.msra.mxu2 %v1224_v29  ;;  %v1286_v45 = vld [vmem:[%s1083_s13 + $0xa8] sm:$0xff]  ;;  %v1294_v47 = vld [vmem:[%s1083_s13 + $0x1a0] sm:$0xff]  ;;  %v1309_v50 = vld [vmem:[%s317_s26] sm:$0xf] }
  0x3f   : > { %488 = vmatpush.msra.mxu1 %v1219_v28  ;;  %529 = vmatpush.msra.mxu3 %v1227_v30  ;;  %1526 = vst [vmem:[#allocation7_spill] sm:$0xff] %v1294_v47  ;;  %v1297_v48 = vld [vmem:[%s1083_s13 + $0x20] sm:$0xff]  ;;  %v346_v51 = vld [vmem:[%s1107_s11 + $0x8] sm:$0xff]  ;;  %v1514_v55 = vperm.slane %v1309_v50, 3  ;;  %v345_v56 = vld [vmem:[%s1107_s11] sm:$0xff]  ;;  %v1517_v61 = vperm.slane %v1309_v50, 1 }
  0x40   : > { %469 = vmatpush.msra.mxu0 %v1232_v31  ;;  %510 = vmatpush.msra.mxu2 %v1240_v33  ;;  %1527 = vst [vmem:[#allocation8_spill] sm:$0xff] %v1297_v48  ;;  %v1302_v49 = vld [vmem:[%s1083_s13 + $0xa0] sm:$0xff]  ;;  %v1315_v52 = vld [vmem:[%s1083_s13 + $0x198] sm:$0xff]  ;;  %v412_v53 = vmul.f32 0.001, %v346_v51  ;;  %v1333_v62 = vld [vmem:[%s1083_s13 + $0x110] sm:$0xff] }
  0x41   : > { %489 = vmatpush.msra.mxu1 %v1235_v32  ;;  %530 = vmatpush.msra.mxu3 %v1243_v34  ;;  %1528 = vst [vmem:[#allocation9_spill] sm:$0xff] %v1302_v49  ;;  %v1323_v57 = vld [vmem:[%s1083_s13 + $0x18] sm:$0xff]  ;;  %v411_v59 = vmul.f32 0.001, %v345_v56  ;;  %v1336_v63 = vld [vmem:[%s1083_s13 + $0x190] sm:$0xff]  ;;  %v423_v0 = vrot.slane %v1514_v55, 4 }
  0x42   : > { %470 = vmatpush.msra.mxu0 %v1248_v35  ;;  %511 = vmatpush.msra.mxu2 %v1256_v37  ;;  %1529 = vst [vmem:[#allocation10_spill] sm:$0xff] %v1315_v52  ;;  %v1326_v58 = vld [vmem:[%s1083_s13 + $0x98] sm:$0xff]  ;;  %v1343_v51 = vld [vmem:[%s1083_s13 + $0x10] sm:$0xff]  ;;  %v422_v60 = vrot.slane %v1517_v61, 4  ;;  %v1353_v55 = vld [vmem:[%s1083_s13 + $0x108] sm:$0xff] }
  0x43   : > { %490 = vmatpush.msra.mxu1 %v1251_v36  ;;  %531 = vmatpush.msra.mxu3 %v1259_v38  ;;  %1530 = vst [vmem:[#allocation11_spill] sm:$0xff] %v1323_v57  ;;  %v1346_v56 = vld [vmem:[%s1083_s13 + $0x90] sm:$0xff]  ;;  %v1356_v54 = vld [vmem:[%s1083_s13 + $0x188] sm:$0xff] }
  0x44   : > { %471 = vmatpush.msra.mxu0 %v1264_v39  ;;  %512 = vmatpush.msra.mxu2 %v1272_v41  ;;  %1531 = vst [vmem:[#allocation12_spill] sm:$0xff] %v1326_v58  ;;  %v1364_v61 = vld [vmem:[%s1083_s13 + $0x8] sm:$0xff] }
  0x45   : > { %491 = vmatpush.msra.mxu1 %v1267_v40  ;;  %532 = vmatpush.msra.mxu3 %v1275_v42  ;;  %1532 = vst [vmem:[#allocation13_spill] sm:$0xff] %v1336_v63 }
  0x46   : > { %472 = vmatpush.msra.mxu0 %v1283_v44  ;;  %513 = vmatpush.msra.mxu2 %v1280_v43  ;;  %435 = vst [vmem:[#allocation1 + $0x10] ss:$2 sm:$0xff] %v412_v53 }
  0x47   : > { %492 = vmatpush.msra.mxu1 %v1286_v45  ;;  %533 = vmatpush.msra.mxu3 %v1294_v47  ;;  %1533 = vst [vmem:[#allocation14_spill] sm:$0xff] %v1346_v56  ;;  %v1375_v47 = vld [vmem:[%s1083_s13 + $0x100] sm:$0xff] }
  0x48   : > { %473 = vmatpush.msra.mxu0 %v1297_v48  ;;  %514 = vmatpush.msra.mxu2 %v1291_v46  ;;  %433 = vst [vmem:[#allocation1] ss:$2 sm:$0xff] %v411_v59  ;;  %v1367_v48 = vld [vmem:[%s1083_s13 + $0x88] sm:$0xff] }
  0x49   : > { %493 = vmatpush.msra.mxu1 %v1302_v49  ;;  %534 = vmatpush.msra.mxu3 %v1315_v52  ;;  %v1534_v52 = vperm.slane %v1309_v50, 2 }
  0x4a   : > { %474 = vmatpush.msra.mxu0 %v1323_v57  ;;  %515 = vmatpush.msra.mxu2 %v1333_v62 }
  0x4b   : > { %494 = vmatpush.msra.mxu1 %v1326_v58  ;;  %v426_v49 = vsel %vm424_vm0, %v1534_v52, %v423_v0  ;;  %535 = vmatpush.msra.mxu3 %v1336_v63  ;;  %v1535_v58 = vperm.slane %v1309_v50, 0  ;;  %v1378_v52 = vld [vmem:[%s1083_s13 + $0x180] sm:$0xff] }
  0x4c   : > { %475 = vmatpush.msra.mxu0 %v1343_v51  ;;  %v430_v0 = vadd.f32 %v426_v49, %v412_v53  ;;  %516 = vmatpush.msra.mxu2 %v1353_v55  ;;  %v1385_v63 = vld [vmem:[%s1083_s13] sm:$0xff] }
  0x4d   : > { %v425_v57 = vsel %vm424_vm0, %v1535_v58, %v422_v60  ;;  %495 = vmatpush.msra.mxu1 %v1346_v56  ;;  %536 = vmatpush.msra.mxu3 %v1356_v54  ;;  %v1388_v58 = vld [vmem:[%s1083_s13 + $0x80] sm:$0xff]  ;;  %v1394_v49 = vld.sshfl [vmem:[#allocation1 + $0x18] sm:$0xff pattern:$0x75316420] }
  0x4e   : > { %476 = vmatpush.msra.mxu0 %v1364_v61  ;;  %v429_v60 = vadd.f32 %v425_v57, %v411_v59  ;;  %517 = vmatpush.msra.mxu2 %v1375_v47  ;;  %v1392_v56 = vld.sshfl [vmem:[#allocation1 + $0x10] sm:$0xff pattern:$0x75316420] }
  0x4f   : > { %496 = vmatpush.msra.mxu1 %v1367_v48  ;;  %537 = vmatpush.msra.mxu3 %v1378_v52  ;;  %453 = vst [vmem:[#allocation1 + $0x10] ss:$2 sm:$0xff] %v430_v0  ;;  %v1398_v53 = vld.sshfl [vmem:[#allocation1] sm:$0xff pattern:$0x75316420] }
  0x50   : > { %585 = vmatpush.msrb.mxu2 %v1116_v1  ;;  %477 = vmatpush.msra.mxu0 %v1385_v63  ;;  %v1402_v57 = vld.sshfl [vmem:[#allocation1 + $0x8] sm:$0xff pattern:$0x75316420] }
  0x51   : > { %605 = vmatpush.msrb.mxu3 %v1122_v3  ;;  %497 = vmatpush.msra.mxu1 %v1388_v58  ;;  %451 = vst [vmem:[#allocation1] ss:$2 sm:$0xff] %v429_v60  ;;  %v1536_v3 = vld [vmem:[#allocation7_spill] sm:$0xff] }
  0x52   : > { %586 = vmatpush.msrb.mxu2 %v1119_v2  ;;  %545 = vmatpush.msrb.mxu0 %v1127_v4 }
  0x53   : > { %565 = vmatpush.msrb.mxu1 %v1130_v5  ;;  %606 = vmatpush.msrb.mxu3 %v1138_v7  ;;  %v1537_v5 = vld [vmem:[#allocation8_spill] sm:$0xff]  ;;  %v1538_v7 = vld [vmem:[#allocation9_spill] sm:$0xff] }
  0x54   : > { %587 = vmatpush.msrb.mxu2 %v1133_v6  ;;  %546 = vmatpush.msrb.mxu0 %v1141_v8  ;;  %v1539_v8 = vld [vmem:[#allocation10_spill] sm:$0xff] }
  0x55   : > { %566 = vmatpush.msrb.mxu1 %v1144_v9  ;;  %607 = vmatpush.msrb.mxu3 %v1149_v10  ;;  %v1540_v9 = vld [vmem:[#allocation11_spill] sm:$0xff]  ;;  %v1541_v10 = vperm.slane %v1309_v50, 2 }
  0x56   : > { %588 = vmatpush.msrb.mxu2 %v1157_v12  ;;  %547 = vmatpush.msrb.mxu0 %v1152_v11  ;;  %v456_v1 = vld.sshfl [vmem:[#allocation1 + $0x10] sm:$0xff pattern:$0x75316420]  ;;  %v457_v2 = vld.sshfl [vmem:[#allocation1 + $0x18] sm:$0xff pattern:$0x75316420] }
  0x57   : > { %567 = vmatpush.msrb.mxu1 %v1160_v13  ;;  %608 = vmatpush.msrb.mxu3 %v1163_v14  ;;  %v446_v11 = vsub.f32 %v1541_v10, %v1392_v56  ;;  %v1542_v12 = vld [vmem:[#allocation12_spill] sm:$0xff]  ;;  %v1543_v13 = vld [vmem:[#allocation13_spill] sm:$0xff]  ;;  %v1544_v14 = vld [vmem:[#allocation14_spill] sm:$0xff] }
  0x58   : > { %589 = vmatpush.msrb.mxu2 %v1176_v17  ;;  %548 = vmatpush.msrb.mxu0 %v1168_v15  ;;  %v454_v4 = vld.sshfl [vmem:[#allocation1] sm:$0xff pattern:$0x75316420]  ;;  %v455_v6 = vld.sshfl [vmem:[#allocation1 + $0x8] sm:$0xff pattern:$0x75316420] }
  0x59   : > { %568 = vmatpush.msrb.mxu1 %v1171_v16  ;;  %609 = vmatpush.msrb.mxu3 %v1179_v18  ;;  %v1545_v15 = vperm.slane %v1309_v50, 3  ;;  %v1546_v17 = vperm.slane %v1309_v50, 0 }
  0x5a   : > { %590 = vmatpush.msrb.mxu2 %v1192_v21  ;;  %549 = vmatpush.msrb.mxu0 %v1184_v19  ;;  %v1547_v19 = vperm.slane %v1309_v50, 1 }
  0x5b   : > { %569 = vmatpush.msrb.mxu1 %v1187_v20  ;;  %610 = vmatpush.msrb.mxu3 %v1195_v22  ;;  %v447_v16 = vsub.f32 %v1545_v15, %v1394_v49  ;;  %v444_v18 = vsub.f32 %v1546_v17, %v1398_v53 }
  0x5c   : > { %591 = vmatpush.msrb.mxu2 %v1208_v25  ;;  %550 = vmatpush.msrb.mxu0 %v1200_v23  ;;  %v445_v20 = vsub.f32 %v1547_v19, %v1402_v57 }
  0x5d   : > { %570 = vmatpush.msrb.mxu1 %v1203_v24  ;;  %611 = vmatpush.msrb.mxu3 %v1211_v26 }
  0x5e   : > { %592 = vmatpush.msrb.mxu2 %v1224_v29  ;;  %551 = vmatpush.msrb.mxu0 %v1216_v27  ;;  %v448_v27 = vld [vmem:[#allocation2] sm:$0xf] }
  0x5f   : > { %571 = vmatpush.msrb.mxu1 %v1219_v28  ;;  %612 = vmatpush.msrb.mxu3 %v1227_v30 }
  0x60   : > { %593 = vmatpush.msrb.mxu2 %v1240_v33  ;;  %552 = vmatpush.msrb.mxu0 %v1232_v31 }
  0x61   : > { %572 = vmatpush.msrb.mxu1 %v1235_v32  ;;  %613 = vmatpush.msrb.mxu3 %v1243_v34 }
  0x62   : > { %594 = vmatpush.msrb.mxu2 %v1256_v37  ;;  %553 = vmatpush.msrb.mxu0 %v1248_v35  ;;  %v544_v35 = vld [vmem:[#allocation3] sm:$0xf] }
  0x63   : > { %573 = vmatpush.msrb.mxu1 %v1251_v36  ;;  %614 = vmatpush.msrb.mxu3 %v1259_v38 }
  0x64   : > { %595 = vmatpush.msrb.mxu2 %v1272_v41  ;;  %554 = vmatpush.msrb.mxu0 %v1264_v39 }
  0x65   : > { %574 = vmatpush.msrb.mxu1 %v1267_v40  ;;  %615 = vmatpush.msrb.mxu3 %v1275_v42 }
  0x66   : > { %596 = vmatpush.msrb.mxu2 %v1280_v43  ;;  %555 = vmatpush.msrb.mxu0 %v1283_v44 }
  0x67   : > { %518 = vmatmul.f32.vlgmr.msra.gmra.mxu2 %v456_v1  ;;  %575 = vmatpush.msrb.mxu1 %v1286_v45 }
  0x68   : > { %597 = vmatpush.msrb.mxu2 %v1291_v46  ;;  %616 = vmatpush.msrb.mxu3 %v1536_v3 }
  0x69   : > { %538 = vmatmul.f32.vlgmr.msra.gmra.mxu3 %v457_v2  ;;  %556 = vmatpush.msrb.mxu0 %v1537_v5 }
  0x6a   : > { %576 = vmatpush.msrb.mxu1 %v1538_v7  ;;  %598 = vmatpush.msrb.mxu2 %v1333_v62 }
  0x6b   : > { %617 = vmatpush.msrb.mxu3 %v1539_v8  ;;  %478 = vmatmul.f32.vlgmr.msra.gmra.mxu0 %v454_v4 }
  0x6c   : > { %498 = vmatmul.f32.vlgmr.msra.gmra.mxu1 %v455_v6  ;;  %557 = vmatpush.msrb.mxu0 %v1540_v9 }
  0x6d   : > { %577 = vmatpush.msrb.mxu1 %v1542_v12  ;;  %599 = vmatpush.msrb.mxu2 %v1353_v55 }
  0x6e   : > { %618 = vmatpush.msrb.mxu3 %v1543_v13  ;;  %558 = vmatpush.msrb.mxu0 %v1343_v51 }
  0x6f   : > { %578 = vmatpush.msrb.mxu1 %v1544_v14  ;;  %600 = vmatpush.msrb.mxu2 %v1375_v47 }
  0x70   : > { %619 = vmatpush.msrb.mxu3 %v1356_v54  ;;  %601 = vmatmul.f32.vlgmr.msrb.gmra.mxu2 %v446_v11 }
  0x71   : > { %559 = vmatpush.msrb.mxu0 %v1364_v61  ;;  %579 = vmatpush.msrb.mxu1 %v1367_v48 }
  0x72   : > { %620 = vmatpush.msrb.mxu3 %v1378_v52 }
  0x73   : > { %621 = vmatmul.f32.vlgmr.msrb.gmra.mxu3 %v447_v16  ;;  %560 = vmatpush.msrb.mxu0 %v1385_v63 }
  0x74   : > { %580 = vmatpush.msrb.mxu1 %v1388_v58  ;;  %561 = vmatmul.f32.vlgmr.msrb.gmra.mxu0 %v444_v18 }
  0x75   : > { %581 = vmatmul.f32.vlgmr.msrb.gmra.mxu1 %v445_v20 }
  0xe8   : > { %v479_v21 = vpop.f32.mrf.mxu0 }
  0xe9   : > { %v499_v22 = vpop.f32.mrf.mxu1 }
  0xea   : > { %v500_v23 = vadd.f32 %v499_v22, %v479_v21  ;;  %v519_v24 = vpop.f32.mrf.mxu2 }
  0xec   : > { %v520_v25 = vadd.f32 %v519_v24, %v500_v23  ;;  %v539_v26 = vpop.f32.mrf.mxu3 }
  0xee   : > { %v540_v28 = vadd.f32 %v539_v26, %v520_v25 }
  0xf0   : > { %v542_v29 = vadd.f32 %v540_v28, %v448_v27 }
  0xf1   : > { %v562_v30 = vpop.f32.mrf.mxu0 }
  0xf2   : > { %543 = vst [vmem:[#allocation2] sm:$0xf] %v542_v29  ;;  %v582_v31 = vpop.f32.mrf.mxu1 }
  0xf3   : > { %v583_v32 = vadd.f32 %v582_v31, %v562_v30  ;;  %v602_v33 = vpop.f32.mrf.mxu2 }
  0xf5   : > { %v603_v34 = vadd.f32 %v602_v33, %v583_v32 }
  0xf6   : > { %v622_v36 = vpop.f32.mrf.mxu3 }
  0xf7   : > { %v623_v37 = vadd.f32 %v622_v36, %v603_v34  ;;  %630 = sbr.rel (%p798_p3) target bundleno = 262 (0x106), region = 48 }
  0xf9   : > { %v625_v38 = vadd.f32 %v623_v37, %v544_v35 }
  0xfb   : > { %626 = vst [vmem:[#allocation3] sm:$0xf] %v625_v38 }
  0xfc   : > { %v632_v39 = vld [vmem:[#allocation2] sm:$0xf]  ;;  %v876_v40 = vld [vmem:[%s1511_s3] ss:$0 sm:$0xff] }
  0xfd   : > { %v636_v42 = vadd.f32 %v876_v40, %v632_v39 }
  0xff   : > { %637 = vst [vmem:[%s1097_s17] sm:$0xf] %v636_v42 }
 0x102   : > { %v638_v41 = vld [vmem:[#allocation3] sm:$0xf] }
 0x103   : > { %v639_v43 = vadd.f32 %v876_v40, %v638_v41 }
 0x105   : > { %640 = vst [vmem:[%s1112_s8] sm:$0xf] %v639_v43 }
 0x106 PF: > { %s19_s25 = sadd.s32 1, %s973_s25   ;;  %s1548_s18 = smov %s949_s19 }
 0x107   : > { %p16_p4 = scmp.ge.s32.totalorder %s19_s25, 6   ;;  %s1549_s19 = smov %s953_s20 }
 0x108   : > { %s1550_s20 = smov %s1066_s7  ;;  %s1551_s21 = smov %s965_s23 }
 0x109   : > { %s1552_s22 = smov %s969_s24  ;;  %s1553_s23 = smov %s1556_s27 }
 0x10a   : > { %s1554_s24 = smov %s1560_s28  ;;  %18 = sbr.rel (!%p16_p4) target bundleno = 5 (0x5), region = 104 }
 0x10f   :  { %674 = vsyncpa [#allocation5], 1 }
 0x110   :  { %676 = vsyncpa [#allocation5 + $0x1], 1 }

// kernel: sub.13
= control target key start
LH: loop header
LB: loop body
LE: loop exit
PB: predicated region body
PF: predicated region fallthrough
CT: control target
= control target key end

     0   :  { %3 = vsyncpa [#allocation1], 0  ;;  %s50_s13 = smov [#allocation0]   ;;  %s75_s0 = inlined_call_operand.vmem [shape: f32[2], index: 0, kind: input, shape index: {}]   ;;  %s76_s1 = inlined_call_operand.vmem [shape: f32[2], index: 1, kind: input, shape index: {}]   ;;  %s77_s2 = inlined_call_operand.hbm [shape: f32[2], index: 2, kind: output, shape index: {}]  }
   0x1   :  { %v4_v0 = vld [vmem:[%s75_s0] sm:$0x1]  ;;  %s16_s2 = sshll.u32 %s77_s2, 4  ;;  %s14_s14 = sshll.u32 %s50_s13, 4  ;;  %s17_s2 = int_to_ptr.hbm [resolvable:$true] %s16_s2  ;;  %s15_s14 = int_to_ptr.vmem [resolvable:$true] %s14_s14 }
   0x2   :  { %v5_v1 = vld [vmem:[%s76_s1] sm:$0x1] }
   0x3   :  { %v8_v2 = vsub.f32 %v4_v0, %v5_v1 }
   0x5   :  { %10 = vst [vmem:[#allocation0] sm:$0x1] %v8_v2 }
   0x6   :  { %19 = dma.vmem_to_hbm [thread:$0]  %s15_s14, 16, %s17_s2, [#allocation1]  }
   0x7   :  { %48 = dma.done.wait [#allocation1], 16  }
   0x8   :  { %49 = vsyncadd [#allocation1], 4294967280 }
   0x9   :  { %22 = vsyncpa [#allocation1], 1 }

// kernel: _nes_core.1
= control target key start
LH: loop header
LB: loop body
LE: loop exit
PB: predicated region body
PF: predicated region fallthrough
CT: control target
= control target key end

     0   :  { %8 = vsyncpa [#allocation4], 0  ;;  %s741_s0 = inlined_call_operand.vmem [shape: f32[2,1024], index: 0, kind: input, shape index: {}]   ;;  %s742_s1 = inlined_call_operand.hbm [shape: f32[1024,128], index: 1, kind: input, shape index: {}]   ;;  %s743_s2 = inlined_call_operand.vmem [shape: f32[1,128], index: 2, kind: input, shape index: {}]   ;;  %s744_s3 = inlined_call_operand.vmem [shape: f32[2,128], index: 3, kind: output, shape index: {}]  }
   0x1   :  { %10 = vsyncpa [#allocation4 + $0x1], 0  ;;  %s573_s12 = smov 0   ;;  %s575_s13 = smov 0  }
   0x2   :  { %s577_s14 = smov 0   ;;  %s579_s15 = smov 0  }
   0x3 LB: > { %s592_s16 = sadd.s32 4294967295, %s548_s15   ;;  %s595_s17 = sadd.s32 1, %s548_s15   ;;  %s548_s15 = sphi %s579_s15, %s751_s15   ;;  %s544_s14 = sphi %s577_s14, %s750_s14   ;;  %s540_s13 = sphi %s575_s13, %s749_s13   ;;  %s536_s12 = sphi %s573_s12, %s748_s12  }
   0x4   : > { %s46_s18 = ssub.s32 %s548_s15, %s595_s17  ;;  %s49_s19 = sadd.s32 1, %s544_s14 }
   0x5   : > { %p47_p0 = scmp.eq.s32.totalorder %s46_s18, 0  ;;  %p56_p1 = scmp.ne.s32.totalorder %s544_s14, %s540_s13 }
   0x6   : > { %p57_p2 = scmp.eq.s32.totalorder %s548_s15, 0  ;;  %p62_p3 = scmp.ne.s32.totalorder %s540_s13, %s536_s12 }
   0x7   : > { %s605_s20 = scalar_select %p47_p0, %s544_s14, %s49_s19  }
   0x8   : > { %p607_p4 = por %p57_p2, %p56_p1  ;;  %p63_p5 = scmp.eq.s32.totalorder %s592_s16, 0 }
   0x9   : > { %p447_p6 = scmp.lt.s32.totalorder %s548_s15, 2  ;;  %s140_s23 = sand.u32 1, %s544_s14  }
   0xa   : > { %p613_p7 = por %p63_p5, %p62_p3  ;;  %s429_s24 = sshll.u32 %s140_s23, 9 }
   0xb   : > { %s440_s25 = sshll.u32 %s548_s15, 9  ;;  %s144_s29 = scalar_lea.vmem [#allocation3], %s429_s24 }
   0xc   : > { %s149_s28 = scalar_lea.hbm %s742_s1, %s440_s25  ;;  %s152_s30 = sshll.u32 %s144_s29, 4  ;;  %s153_s30 = int_to_ptr.vmem [resolvable:$true] %s152_s30 }
   0xd   : > { %s150_s4 = sshll.u32 %s149_s28, 4  ;;  %p624_p8 = pnand %p447_p6, %p607_p4  ;;  %s151_s4 = int_to_ptr.hbm [resolvable:$true] %s150_s4 }
   0xe   : > { %p432_p9 = scmp.ge.s32.totalorder %s548_s15, 1  ;;  %s141_s6 = scalar_lea.sflag [#allocation4], %s140_s23 }
   0xf   : > { %s484_s7 = sshra.s32 %s151_s4, 4  ;;  %p488_p11 = pneg %p624_p8  ;;  %s485_s7 = int_to_ptr.hbm [resolvable:$true] %s484_s7 }
  0x10   : > { %s486_s8 = scalar_lea.hbm %s485_s7, 512  ;;  %s491_s11 = scalar_lea.hbm %s742_s1, 1024 }
  0x11   : > { %p487_p10 = scmp.ne.s32.totalorder %s485_s7, %s486_s8  ;;  %p492_p0 = scmp.lt.s32.totalorder %s485_s7, %s742_s1 }
  0x12   : > { %p493_p1 = scmp.lt.s32.totalorder %s491_s11, %s486_s8 }
  0x13   : > { %p489_p12 = pnand %p488_p11, %p487_p10 }
  0x14   : > { %p494_p2 = por %p493_p1, %p492_p0 }
  0x15   : > { %p490_p13 = pneg %p489_p12 }
  0x17   : > { %p495_p3 = pnand %p494_p2, %p490_p13 }
  0x19   : > { %498 = shalt.err (!%p495_p3)
}
  0x1a   : > { %s550_s19 = smov 128   ;;  %s551_s21 = smov 8  }
  0x1b   : > { %446 = dma.hbm_to_vmem [thread:$0]  (!%p624_p8), %s151_s4, 8192, %s153_s30, %s141_s6, %s550_s19, %s550_s19, %s551_s21  }
  0x1c   : > { %p160_p4 = scmp.lt.s32.totalorder %s548_s15, 3 }
  0x1e   : > { %p161_p5 = pnand %p432_p9, %p160_p4 }
  0x1f   : > { %s166_s23 = sand.u32 (!%p161_p5), 1, %s540_s13  }
  0x20   : > { %164 = sbr.rel (%p161_p5) target bundleno = 229 (0xe5), region = 32  ;;  %s433_s24 = sshll.u32 (!%p161_p5), %s166_s23, 9 }
  0x21   : > { %s167_s25 = scalar_lea.sflag (!%p161_p5), [#allocation4], %s166_s23  ;;  %s643_s26 = scalar_lea.vmem (!%p161_p5), [#allocation3], %s433_s24 }
  0x25   : > { %531 = dma.done.wait (%p613_p7), %s167_s25, 8192  }
  0x26   : > { %533 = vsyncadd (%p613_p7), %s167_s25, 4294959104  ;;  %s434_s27 = sshll.u32 %s592_s16, 2  ;;  %p436_p8 = scmp.ne.s32.totalorder %s592_s16, 0 }
  0x27   : > { %p195_p6 = scmp.lt.s32.totalorder %s434_s27, 7 }
  0x28   : > { %204 = sbr.rel (%p436_p8) target bundleno = 47 (0x2f), region = 40 }
  0x29   : > { %s753_s27 = smov (!%p195_p6, %s434_s27), 7 }
  0x2a   : > { %s435_s28 = sshll.u32 %s753_s27, 1 }
  0x2b   : > { %s653_s30 = scalar_lea.vmem %s741_s0, %s435_s28 }
  0x2d   : > { %v552_v0 = vmov 0.0  }
  0x2e   : > { %205 = vst [vmem:[#allocation2] sm:$0x3] %v552_v0 }
  0x2f PF: > { %v255_v1 = vld [vmem:[%s643_s26 + $0x178] sm:$0xff]  ;;  %v254_v2 = vld [vmem:[%s643_s26 + $0x170] sm:$0xff]  ;;  %v253_v6 = vld [vmem:[%s643_s26 + $0x168] sm:$0xff]  ;;  %p437_p7 = scmp.ne.s32.totalorder %s592_s16, 1 }
  0x30   : > { %v271_v3 = vld [vmem:[%s643_s26 + $0x1f8] sm:$0xff]  ;;  %322 = vmatpush.msra.mxu2 %v255_v1  ;;  %v270_v7 = vld [vmem:[%s643_s26 + $0x1f0] sm:$0xff]  ;;  %v269_v10 = vld [vmem:[%s643_s26 + $0x1e8] sm:$0xff] }
  0x31   : > { %342 = vmatpush.msra.mxu3 %v271_v3  ;;  %v223_v4 = vld [vmem:[%s643_s26 + $0x78] sm:$0xff]  ;;  %v222_v8 = vld [vmem:[%s643_s26 + $0x70] sm:$0xff]  ;;  %v221_v11 = vld [vmem:[%s643_s26 + $0x68] sm:$0xff] }
  0x32   : > { %v239_v5 = vld [vmem:[%s643_s26 + $0xf8] sm:$0xff]  ;;  %282 = vmatpush.msra.mxu0 %v223_v4  ;;  %v238_v9 = vld [vmem:[%s643_s26 + $0xf0] sm:$0xff]  ;;  %323 = vmatpush.msra.mxu2 %v254_v2  ;;  %v252_v12 = vld [vmem:[%s643_s26 + $0x160] sm:$0xff] }
  0x33   : > { %302 = vmatpush.msra.mxu1 %v239_v5  ;;  %343 = vmatpush.msra.mxu3 %v270_v7  ;;  %v237_v13 = vld [vmem:[%s643_s26 + $0xe8] sm:$0xff]  ;;  %v268_v14 = vld [vmem:[%s643_s26 + $0x1e0] sm:$0xff]  ;;  %v251_v17 = vld [vmem:[%s643_s26 + $0x158] sm:$0xff] }
  0x34   : > { %283 = vmatpush.msra.mxu0 %v222_v8  ;;  %324 = vmatpush.msra.mxu2 %v253_v6  ;;  %v220_v15 = vld [vmem:[%s643_s26 + $0x60] sm:$0xff]  ;;  %v267_v18 = vld [vmem:[%s643_s26 + $0x1d8] sm:$0xff]  ;;  %v250_v21 = vld [vmem:[%s643_s26 + $0x150] sm:$0xff] }
  0x35   : > { %303 = vmatpush.msra.mxu1 %v238_v9  ;;  %344 = vmatpush.msra.mxu3 %v269_v10  ;;  %v236_v16 = vld [vmem:[%s643_s26 + $0xe0] sm:$0xff]  ;;  %v219_v19 = vld [vmem:[%s643_s26 + $0x58] sm:$0xff]  ;;  %v266_v22 = vld [vmem:[%s643_s26 + $0x1d0] sm:$0xff] }
  0x36   : > { %284 = vmatpush.msra.mxu0 %v221_v11  ;;  %325 = vmatpush.msra.mxu2 %v252_v12  ;;  %v235_v20 = vld [vmem:[%s643_s26 + $0xd8] sm:$0xff]  ;;  %v218_v23 = vld [vmem:[%s643_s26 + $0x50] sm:$0xff]  ;;  %v249_v25 = vld [vmem:[%s643_s26 + $0x148] sm:$0xff] }
  0x37   : > { %304 = vmatpush.msra.mxu1 %v237_v13  ;;  %345 = vmatpush.msra.mxu3 %v268_v14  ;;  %v234_v24 = vld [vmem:[%s643_s26 + $0xd0] sm:$0xff]  ;;  %v265_v26 = vld [vmem:[%s643_s26 + $0x1c8] sm:$0xff]  ;;  %v248_v29 = vld [vmem:[%s643_s26 + $0x140] sm:$0xff] }
  0x38   : > { %285 = vmatpush.msra.mxu0 %v220_v15  ;;  %326 = vmatpush.msra.mxu2 %v251_v17  ;;  %v217_v27 = vld [vmem:[%s643_s26 + $0x48] sm:$0xff]  ;;  %v264_v30 = vld [vmem:[%s643_s26 + $0x1c0] sm:$0xff]  ;;  %v247_v33 = vld [vmem:[%s643_s26 + $0x138] sm:$0xff] }
  0x39   : > { %305 = vmatpush.msra.mxu1 %v236_v16  ;;  %346 = vmatpush.msra.mxu3 %v267_v18  ;;  %v233_v28 = vld [vmem:[%s643_s26 + $0xc8] sm:$0xff]  ;;  %v216_v31 = vld [vmem:[%s643_s26 + $0x40] sm:$0xff]  ;;  %v263_v34 = vld [vmem:[%s643_s26 + $0x1b8] sm:$0xff] }
  0x3a   : > { %286 = vmatpush.msra.mxu0 %v219_v19  ;;  %327 = vmatpush.msra.mxu2 %v250_v21  ;;  %v232_v32 = vld [vmem:[%s643_s26 + $0xc0] sm:$0xff]  ;;  %v215_v35 = vld [vmem:[%s643_s26 + $0x38] sm:$0xff]  ;;  %v246_v37 = vld [vmem:[%s643_s26 + $0x130] sm:$0xff] }
  0x3b   : > { %306 = vmatpush.msra.mxu1 %v235_v20  ;;  %347 = vmatpush.msra.mxu3 %v266_v22  ;;  %v231_v36 = vld [vmem:[%s643_s26 + $0xb8] sm:$0xff]  ;;  %v262_v38 = vld [vmem:[%s643_s26 + $0x1b0] sm:$0xff]  ;;  %v245_v41 = vld [vmem:[%s643_s26 + $0x128] sm:$0xff] }
  0x3c   : > { %287 = vmatpush.msra.mxu0 %v218_v23  ;;  %328 = vmatpush.msra.mxu2 %v249_v25  ;;  %v214_v39 = vld [vmem:[%s643_s26 + $0x30] sm:$0xff]  ;;  %v261_v42 = vld [vmem:[%s643_s26 + $0x1a8] sm:$0xff]  ;;  %v244_v46 = vld [vmem:[%s643_s26 + $0x120] sm:$0xff] }
  0x3d   : > { %307 = vmatpush.msra.mxu1 %v234_v24  ;;  %348 = vmatpush.msra.mxu3 %v265_v26  ;;  %v230_v40 = vld [vmem:[%s643_s26 + $0xb0] sm:$0xff]  ;;  %v213_v43 = vld [vmem:[%s643_s26 + $0x28] sm:$0xff]  ;;  %v260_v47 = vld [vmem:[%s643_s26 + $0x1a0] sm:$0xff] }
  0x3e   : > { %288 = vmatpush.msra.mxu0 %v217_v27  ;;  %329 = vmatpush.msra.mxu2 %v248_v29  ;;  %v229_v44 = vld [vmem:[%s643_s26 + $0xa8] sm:$0xff]  ;;  %v207_v45 = vld [vmem:[%s653_s30] sm:$0xff]  ;;  %v212_v48 = vld [vmem:[%s643_s26 + $0x20] sm:$0xff] }
  0x3f   : > { %308 = vmatpush.msra.mxu1 %v233_v28  ;;  %349 = vmatpush.msra.mxu3 %v264_v30  ;;  %273 = vst [vmem:[#allocation1] ss:$4 sm:$0xff] %v207_v45  ;;  %v228_v49 = vld [vmem:[%s643_s26 + $0xa0] sm:$0xff]  ;;  %v243_v50 = vld [vmem:[%s643_s26 + $0x118] sm:$0xff]  ;;  %v242_v54 = vld [vmem:[%s643_s26 + $0x110] sm:$0xff] }
  0x40   : > { %289 = vmatpush.msra.mxu0 %v216_v31  ;;  %330 = vmatpush.msra.mxu2 %v247_v33  ;;  %v259_v51 = vld [vmem:[%s643_s26 + $0x198] sm:$0xff]  ;;  %v258_v55 = vld [vmem:[%s643_s26 + $0x190] sm:$0xff]  ;;  %v241_v58 = vld [vmem:[%s643_s26 + $0x108] sm:$0xff] }
  0x41   : > { %309 = vmatpush.msra.mxu1 %v232_v32  ;;  %350 = vmatpush.msra.mxu3 %v263_v34  ;;  %v211_v52 = vld [vmem:[%s643_s26 + $0x18] sm:$0xff]  ;;  %v210_v56 = vld [vmem:[%s643_s26 + $0x10] sm:$0xff]  ;;  %v257_v59 = vld [vmem:[%s643_s26 + $0x188] sm:$0xff] }
  0x42   : > { %290 = vmatpush.msra.mxu0 %v215_v35  ;;  %331 = vmatpush.msra.mxu2 %v246_v37  ;;  %v227_v53 = vld [vmem:[%s643_s26 + $0x98] sm:$0xff]  ;;  %v226_v57 = vld [vmem:[%s643_s26 + $0x90] sm:$0xff]  ;;  %v209_v60 = vld [vmem:[%s643_s26 + $0x8] sm:$0xff] }
  0x43   : > { %310 = vmatpush.msra.mxu1 %v231_v36  ;;  %351 = vmatpush.msra.mxu3 %v262_v38  ;;  %v225_v61 = vld [vmem:[%s643_s26 + $0x88] sm:$0xff]  ;;  %v240_v62 = vld [vmem:[%s643_s26 + $0x100] sm:$0xff]  ;;  %v206_v12 = vld [vmem:[#allocation2] sm:$0x3] }
  0x44   : > { %291 = vmatpush.msra.mxu0 %v214_v39  ;;  %332 = vmatpush.msra.mxu2 %v245_v41  ;;  %v256_v63 = vld [vmem:[%s643_s26 + $0x180] sm:$0xff] }
  0x45   : > { %311 = vmatpush.msra.mxu1 %v230_v40  ;;  %352 = vmatpush.msra.mxu3 %v261_v42  ;;  %v208_v2 = vld [vmem:[%s643_s26] sm:$0xff] }
  0x46   : > { %292 = vmatpush.msra.mxu0 %v213_v43  ;;  %333 = vmatpush.msra.mxu2 %v244_v46  ;;  %v276_v0 = vld.sshfl [vmem:[#allocation1 + $0x10] sm:$0xff pattern:$0x73625140]  ;;  %v277_v1 = vld.sshfl [vmem:[#allocation1 + $0x18] sm:$0xff pattern:$0x73625140] }
  0x47   : > { %312 = vmatpush.msra.mxu1 %v229_v44  ;;  %353 = vmatpush.msra.mxu3 %v260_v47  ;;  %v224_v3 = vld [vmem:[%s643_s26 + $0x80] sm:$0xff]  ;;  %v274_v4 = vld.sshfl [vmem:[#allocation1] sm:$0xff pattern:$0x73625140] }
  0x48   : > { %293 = vmatpush.msra.mxu0 %v212_v48  ;;  %334 = vmatpush.msra.mxu2 %v243_v50  ;;  %v275_v5 = vld.sshfl [vmem:[#allocation1 + $0x8] sm:$0xff pattern:$0x73625140] }
  0x49   : > { %313 = vmatpush.msra.mxu1 %v228_v49  ;;  %354 = vmatpush.msra.mxu3 %v259_v51 }
  0x4a   : > { %294 = vmatpush.msra.mxu0 %v211_v52  ;;  %335 = vmatpush.msra.mxu2 %v242_v54 }
  0x4b   : > { %314 = vmatpush.msra.mxu1 %v227_v53  ;;  %355 = vmatpush.msra.mxu3 %v258_v55 }
  0x4c   : > { %295 = vmatpush.msra.mxu0 %v210_v56  ;;  %336 = vmatpush.msra.mxu2 %v241_v58 }
  0x4d   : > { %315 = vmatpush.msra.mxu1 %v226_v57  ;;  %356 = vmatpush.msra.mxu3 %v257_v59 }
  0x4e   : > { %296 = vmatpush.msra.mxu0 %v209_v60  ;;  %337 = vmatpush.msra.mxu2 %v240_v62 }
  0x4f   : > { %316 = vmatpush.msra.mxu1 %v225_v61  ;;  %357 = vmatpush.msra.mxu3 %v256_v63 }
  0x50   : > { %338 = vmatmul.f32.vlgmr.msra.gmra.mxu2 %v276_v0  ;;  %358 = vmatmul.f32.vlgmr.msra.gmra.mxu3 %v277_v1 }
  0x51   : > { %297 = vmatpush.msra.mxu0 %v208_v2  ;;  %317 = vmatpush.msra.mxu1 %v224_v3 }
  0x52   : > { %298 = vmatmul.f32.vlgmr.msra.gmra.mxu0 %v274_v4  ;;  %318 = vmatmul.f32.vlgmr.msra.gmra.mxu1 %v275_v5 }
  0xcf   : > { %v299_v6 = vpop.f32.mrf.mxu0  ;;  %v319_v7 = vpop.f32.mrf.mxu1 }
  0xd0   : > { %v320_v8 = vadd.f32 %v319_v7, %v299_v6 }
  0xd3   : > { %v339_v9 = vpop.f32.mrf.mxu2  ;;  %v359_v10 = vpop.f32.mrf.mxu3 }
  0xd4   : > { %v340_v11 = vadd.f32 %v339_v9, %v320_v8 }
  0xd6   : > { %v360_v13 = vadd.f32 %v359_v10, %v340_v11  ;;  %367 = sbr.rel (%p437_p7) target bundleno = 229 (0xe5), region = 44 }
  0xd8   : > { %v362_v14 = vadd.f32 %v360_v13, %v206_v12 }
  0xda   : > { %363 = vst [vmem:[#allocation2] sm:$0x3] %v362_v14 }
  0xdb   : > { %v483_v16 = vld [vmem:[%s743_s2] ss:$0 sm:$0xff] }
  0xe1   : > { %v368_v15 = vld [vmem:[#allocation2] sm:$0x3] }
  0xe2   : > { %v373_v17 = vadd.f32 %v483_v16, %v368_v15 }
  0xe4   : > { %374 = vst [vmem:[%s744_s3] sm:$0x3] %v373_v17 }
  0xe5 PF: > { %p13_p9 = scmp.ge.s32.totalorder %s595_s17, 4   ;;  %s748_s12 = smov %s540_s13 }
  0xe6   : > { %s749_s13 = smov %s544_s14  ;;  %s750_s14 = smov %s605_s20 }
  0xe7   : > { %s751_s15 = smov %s595_s17  ;;  %15 = sbr.rel (!%p13_p9) target bundleno = 3 (0x3), region = 79 }
  0xec   :  { %386 = vsyncpa [#allocation4], 1 }
  0xed   :  { %388 = vsyncpa [#allocation4 + $0x1], 1 }

</bundles_post_ra>
